<compile_context>
chip_gen: v5e
topology: v5e:2x2
jax: 0.10.0
libtpu: 0.0.40
codegen_flags: <defaults>
</compile_context>

<pallas_src>
import functools

import jax
import jax.numpy as jnp
from jax.experimental import pallas as pl
from jax.experimental.pallas import tpu as pltpu

LANE = 128      # lane width (last dim)
SUBLANE = 8     # sublane width (second-to-last dim)
TB_MAX = 512    # max batch tile (rows) for the gridded path


def _round_up(n, m):
    return ((n + m - 1) // m) * m


# ----------------------------- Pallas kernel --------------------------------
def _mlp_fused_kernel(*refs, n_layers):
    # refs = (x_ref, w1_ref, b1_ref, ..., wL_ref, bL_ref, o_ref)
    #   x_ref : (TB, n_in_pad)        VMEM
    #   wi_ref: (in_pad_i, out_pad_i) VMEM  (already transposed + zero padded)
    #   bi_ref: (1, out_pad_i)        VMEM
    #   o_ref : (TB, n_out_pad)       VMEM
    x_ref = refs[0]
    o_ref = refs[-1]
    wb = refs[1:-1]

    h = x_ref[...]
    for i in range(n_layers):
        w = wb[2 * i][...]
        b = wb[2 * i + 1][...]
        h = jnp.dot(h, w, preferred_element_type=jnp.float32) + b
        if i < n_layers - 1:
            h = jnp.maximum(h, 0.0)          # ReLU between layers, none after last
    o_ref[...] = h.astype(o_ref.dtype)


def _fused_mlp_pallas(x_pad, wts, bs, tb):
    """x_pad: (B_pad, n_in_pad); wts[i]: (in_pad, out_pad); bs[i]: (1, out_pad)."""
    n_layers = len(wts)
    B_pad, n_in_pad = x_pad.shape
    n_out_pad = wts[-1].shape[1]
    grid = (B_pad // tb,)

    vmem = pltpu.MemorySpace.VMEM
    in_specs = [pl.BlockSpec((tb, n_in_pad), lambda i: (i, 0), memory_space=vmem)]
    operands = [x_pad]
    for w, b in zip(wts, bs):
        in_specs.append(pl.BlockSpec(w.shape, lambda i: (0, 0), memory_space=vmem))
        in_specs.append(pl.BlockSpec(b.shape, lambda i: (0, 0), memory_space=vmem))
        operands.append(w)
        operands.append(b)

    out_spec = pl.BlockSpec((tb, n_out_pad), lambda i: (i, 0), memory_space=vmem)

    return pl.pallas_call(
        functools.partial(_mlp_fused_kernel, n_layers=n_layers),
        out_shape=jax.ShapeDtypeStruct((B_pad, n_out_pad), x_pad.dtype),
        grid=grid,
        in_specs=in_specs,
        out_specs=out_spec,
        compiler_params=pltpu.CompilerParams(
            dimension_semantics=("parallel",),
        ),
    )(*operands)


def _mlp_forward(x, *, wts, bs, n_output):
    """Pad batch/features, run fused kernel, slice back to logical shape."""
    B, n_in = x.shape
    n_in_pad = wts[0].shape[0]

    if B <= TB_MAX:
        B_pad = _round_up(max(B, 1), SUBLANE)
        tb = B_pad
    else:
        B_pad = _round_up(B, TB_MAX)
        tb = TB_MAX

    x_pad = jnp.zeros((B_pad, n_in_pad), x.dtype).at[:B, :n_in].set(x)
    y_pad = _fused_mlp_pallas(x_pad, wts, bs, tb)
    return y_pad[:B, :n_output]


# --------------------------- NetworkNNET in JAX ------------------------------
class NetworkNNET:
    """JAX/Pallas port of the PyTorch NetworkNNET forward pass.

    The .nnet file only defines a fully-connected ReLU network; here the
    weights/biases/normalization constants are synthesized deterministically
    instead of being parsed from disk.
    """

    def __init__(self, layer_sizes, key):
        # layer_sizes, e.g. [n_input, h1, h2, ..., n_output]
        self.weights = []   # PyTorch-style (out, in), unpadded, for reference path
        self.biases = []    # (out,), unpadded
        n_layers = len(layer_sizes) - 1
        keys = jax.random.split(key, 2 * n_layers)
        for i in range(n_layers):
            n_in, n_out = layer_sizes[i], layer_sizes[i + 1]
            w = jax.random.normal(keys[2 * i], (n_out, n_in), jnp.float32) * 0.3
            b = jax.random.normal(keys[2 * i + 1], (n_out,), jnp.float32) * 0.1
            self.weights.append(w)
            self.biases.append(b)

        self.n_input = layer_sizes[0]
        self.n_output = layer_sizes[-1]

        # Precompute (once) transposed + zero-padded parameters for the fused kernel:
        #   wt_pad[i]: (in_pad, out_pad), b_pad[i]: (1, out_pad), lane-dense.
        padded = [_round_up(s, LANE) for s in layer_sizes]
        wt_pad, b_pad = [], []
        for i in range(n_layers):
            n_in, n_out = layer_sizes[i], layer_sizes[i + 1]
            in_p, out_p = padded[i], padded[i + 1]
            wtp = jnp.zeros((in_p, out_p), jnp.float32)
            wtp = wtp.at[:n_in, :n_out].set(jnp.transpose(self.weights[i]))
            bp = jnp.zeros((1, out_p), jnp.float32)
            bp = bp.at[0, :n_out].set(self.biases[i])
            wt_pad.append(wtp)
            b_pad.append(bp)
        self._wt_pad = tuple(wt_pad)
        self._b_pad = tuple(b_pad)

        # Single jitted forward: padding glue + one fused pallas_call.
        self._forward_jit = jax.jit(
            functools.partial(
                _mlp_forward,
                wts=self._wt_pad,
                bs=self._b_pad,
                n_output=self.n_output,
            )
        )

        # Normalization metadata kept for parity with the PyTorch module
        # (unused in forward(), just as in the reference implementation).
        self.input_lower_bounds = [-1.0] * self.n_input
        self.input_upper_bounds = [1.0] * self.n_input
        self.input_means = [0.0] * self.n_input
        self.input_ranges = [1.0] * self.n_input
        self.output_mean = 0.0
        self.output_range = 1.0
        self.input_shape = (1, self.n_input)

    def forward(self, x):
        return self._forward_jit(x)

    def forward_ref(self, x):
        # Pure-JAX reference for correctness checking (unpadded math).
        n_layers = len(self.weights)
        for i in range(n_layers):
            x = x @ self.weights[i].T + self.biases[i]
            if i < n_layers - 1:
                x = jnp.maximum(x, 0.0)
        return x


# --------------------------------- main --------------------------------------
if __name__ == "__main__":
    key = jax.random.PRNGKey(0)
    k_net, k_x = jax.random.split(key)

    # ACAS-Xu-like small MLP: 5 inputs, two hidden layers of 32, 5 outputs.
    layer_sizes = [5, 32, 32, 5]
    net = NetworkNNET(layer_sizes, k_net)

    batch = 2
    x = jax.random.normal(k_x, (batch, net.n_input), jnp.float32)

    y = net.forward(x)
    y = jax.block_until_ready(y)

    y_ref = net.forward_ref(x)
    assert y.shape == (batch, net.n_output)
    assert jnp.allclose(y, y_ref, atol=1e-4, rtol=1e-4), "mismatch vs reference"

    print("KERNEL_OK")
</pallas_src>

<mosaic_0001>
module attributes {stable_mosaic.version = 11 : i64} {
  func.func @_mlp_fused_kernel(%arg0: i32, %arg1: memref<8x128xf32, #tpu.memory_space<vmem>>, %arg2: memref<128x128xf32, #tpu.memory_space<vmem>>, %arg3: memref<1x128xf32, #tpu.memory_space<vmem>>, %arg4: memref<128x128xf32, #tpu.memory_space<vmem>>, %arg5: memref<1x128xf32, #tpu.memory_space<vmem>>, %arg6: memref<128x128xf32, #tpu.memory_space<vmem>>, %arg7: memref<1x128xf32, #tpu.memory_space<vmem>>, %arg8: memref<8x128xf32, #tpu.memory_space<vmem>>) attributes {dimension_semantics = [#tpu.dimension_semantics<parallel>], iteration_bounds = array<i64: 1>, scalar_prefetch = 0 : i64, scratch_operands = 0 : i64, tpu.core_type = #tpu.core_type<tc>, window_params = [{transform_indices = @transform_0, window_bounds = array<i64: 8, 128>}, {pipeline_mode = #tpu.pipeline_mode<synchronous>, transform_indices = @transform_1, window_bounds = array<i64: 128, 128>}, {pipeline_mode = #tpu.pipeline_mode<synchronous>, transform_indices = @transform_2, window_bounds = array<i64: 1, 128>}, {pipeline_mode = #tpu.pipeline_mode<synchronous>, transform_indices = @transform_3, window_bounds = array<i64: 128, 128>}, {pipeline_mode = #tpu.pipeline_mode<synchronous>, transform_indices = @transform_4, window_bounds = array<i64: 1, 128>}, {pipeline_mode = #tpu.pipeline_mode<synchronous>, transform_indices = @transform_5, window_bounds = array<i64: 128, 128>}, {pipeline_mode = #tpu.pipeline_mode<synchronous>, transform_indices = @transform_6, window_bounds = array<i64: 1, 128>}, {transform_indices = @transform_7, window_bounds = array<i64: 8, 128>}]} {
    %c0 = arith.constant 0 : index
    %c0_0 = arith.constant 0 : index
    %0 = vector.load %arg1[%c0, %c0_0] : memref<8x128xf32, #tpu.memory_space<vmem>>, vector<8x128xf32>
    %c0_1 = arith.constant 0 : index
    %c0_2 = arith.constant 0 : index
    %1 = vector.load %arg2[%c0_1, %c0_2] : memref<128x128xf32, #tpu.memory_space<vmem>>, vector<128x128xf32>
    %c0_3 = arith.constant 0 : index
    %c0_4 = arith.constant 0 : index
    %2 = vector.load %arg3[%c0_3, %c0_4] : memref<1x128xf32, #tpu.memory_space<vmem>>, vector<1x128xf32>
    %cst = arith.constant dense<0.000000e+00> : vector<8x128xf32>
    %3 = tpu.matmul %0, %1, %cst {dimension_numbers = #tpu.dot_dimension_numbers<[1], [0], [0], [1], [0, 0, 1, 1], [], []>} : vector<8x128xf32>, vector<128x128xf32>, vector<8x128xf32> -> vector<8x128xf32>
    %4 = vector.broadcast %2 : vector<1x128xf32> to vector<8x128xf32>
    %5 = arith.addf %3, %4 : vector<8x128xf32>
    %cst_5 = arith.constant 0.000000e+00 : f32
    %6 = vector.broadcast %cst_5 : f32 to vector<8x128xf32>
    %7 = arith.maximumf %5, %6 : vector<8x128xf32>
    %c0_6 = arith.constant 0 : index
    %c0_7 = arith.constant 0 : index
    %8 = vector.load %arg4[%c0_6, %c0_7] : memref<128x128xf32, #tpu.memory_space<vmem>>, vector<128x128xf32>
    %c0_8 = arith.constant 0 : index
    %c0_9 = arith.constant 0 : index
    %9 = vector.load %arg5[%c0_8, %c0_9] : memref<1x128xf32, #tpu.memory_space<vmem>>, vector<1x128xf32>
    %cst_10 = arith.constant dense<0.000000e+00> : vector<8x128xf32>
    %10 = tpu.matmul %7, %8, %cst_10 {dimension_numbers = #tpu.dot_dimension_numbers<[1], [0], [0], [1], [0, 0, 1, 1], [], []>} : vector<8x128xf32>, vector<128x128xf32>, vector<8x128xf32> -> vector<8x128xf32>
    %11 = vector.broadcast %9 : vector<1x128xf32> to vector<8x128xf32>
    %12 = arith.addf %10, %11 : vector<8x128xf32>
    %cst_11 = arith.constant 0.000000e+00 : f32
    %13 = vector.broadcast %cst_11 : f32 to vector<8x128xf32>
    %14 = arith.maximumf %12, %13 : vector<8x128xf32>
    %c0_12 = arith.constant 0 : index
    %c0_13 = arith.constant 0 : index
    %15 = vector.load %arg6[%c0_12, %c0_13] : memref<128x128xf32, #tpu.memory_space<vmem>>, vector<128x128xf32>
    %c0_14 = arith.constant 0 : index
    %c0_15 = arith.constant 0 : index
    %16 = vector.load %arg7[%c0_14, %c0_15] : memref<1x128xf32, #tpu.memory_space<vmem>>, vector<1x128xf32>
    %cst_16 = arith.constant dense<0.000000e+00> : vector<8x128xf32>
    %17 = tpu.matmul %14, %15, %cst_16 {dimension_numbers = #tpu.dot_dimension_numbers<[1], [0], [0], [1], [0, 0, 1, 1], [], []>} : vector<8x128xf32>, vector<128x128xf32>, vector<8x128xf32> -> vector<8x128xf32>
    %18 = vector.broadcast %16 : vector<1x128xf32> to vector<8x128xf32>
    %19 = arith.addf %17, %18 : vector<8x128xf32>
    %c0_17 = arith.constant 0 : index
    %c0_18 = arith.constant 0 : index
    %20 = vector.load %arg8[%c0_17, %c0_18] : memref<8x128xf32, #tpu.memory_space<vmem>>, vector<8x128xf32>
    tpu.vector_store %arg8[%c0_17, %c0_18], %19 {strides = array<i32>} : memref<8x128xf32, #tpu.memory_space<vmem>>, vector<8x128xf32>,
    return
  }
  func.func @transform_0(%arg0: i32) -> (i32, i32) {
    %c0_i32 = arith.constant 0 : i32
    %c0_i32_0 = arith.constant 0 : i32
    return %arg0, %c0_i32 : i32, i32
  }
  func.func @transform_1(%arg0: i32) -> (i32, i32) {
    %c0_i32 = arith.constant 0 : i32
    %c0_i32_0 = arith.constant 0 : i32
    %c0_i32_1 = arith.constant 0 : i32
    return %c0_i32, %c0_i32_0 : i32, i32
  }
  func.func @transform_2(%arg0: i32) -> (i32, i32) {
    %c0_i32 = arith.constant 0 : i32
    %c0_i32_0 = arith.constant 0 : i32
    %c0_i32_1 = arith.constant 0 : i32
    return %c0_i32, %c0_i32_0 : i32, i32
  }
  func.func @transform_3(%arg0: i32) -> (i32, i32) {
    %c0_i32 = arith.constant 0 : i32
    %c0_i32_0 = arith.constant 0 : i32
    %c0_i32_1 = arith.constant 0 : i32
    return %c0_i32, %c0_i32_0 : i32, i32
  }
  func.func @transform_4(%arg0: i32) -> (i32, i32) {
    %c0_i32 = arith.constant 0 : i32
    %c0_i32_0 = arith.constant 0 : i32
    %c0_i32_1 = arith.constant 0 : i32
    return %c0_i32, %c0_i32_0 : i32, i32
  }
  func.func @transform_5(%arg0: i32) -> (i32, i32) {
    %c0_i32 = arith.constant 0 : i32
    %c0_i32_0 = arith.constant 0 : i32
    %c0_i32_1 = arith.constant 0 : i32
    return %c0_i32, %c0_i32_0 : i32, i32
  }
  func.func @transform_6(%arg0: i32) -> (i32, i32) {
    %c0_i32 = arith.constant 0 : i32
    %c0_i32_0 = arith.constant 0 : i32
    %c0_i32_1 = arith.constant 0 : i32
    return %c0_i32, %c0_i32_0 : i32, i32
  }
  func.func @transform_7(%arg0: i32) -> (i32, i32) {
    %c0_i32 = arith.constant 0 : i32
    %c0_i32_0 = arith.constant 0 : i32
    return %arg0, %c0_i32 : i32, i32
  }
}

</mosaic_0001>

<bundles_post_ra>
// kernel: _mlp_forward.1
= control target key start
LH: loop header
LB: loop body
LE: loop exit
PB: predicated region body
PF: predicated region fallthrough
CT: control target
= control target key end

     0   :  { %12 = vsyncpa [#allocation3], 0  ;;  %s356_s0 = inlined_call_operand.vmem [shape: f32[8,128], index: 0, kind: input, shape index: {}]   ;;  %s357_s1 = inlined_call_operand.hbm [shape: f32[128,128], index: 1, kind: input, shape index: {}]   ;;  %s358_s2 = inlined_call_operand.vmem [shape: f32[1,128], index: 2, kind: input, shape index: {}]   ;;  %s359_s3 = inlined_call_operand.hbm [shape: f32[128,128], index: 3, kind: input, shape index: {}]   ;;  %s360_s4 = inlined_call_operand.vmem [shape: f32[1,128], index: 4, kind: input, shape index: {}]   ;;  %s361_s5 = inlined_call_operand.hbm [shape: f32[128,128], index: 5, kind: input, shape index: {}]   ;;  %s362_s6 = inlined_call_operand.vmem [shape: f32[1,128], index: 6, kind: input, shape index: {}]   ;;  %s363_s7 = inlined_call_operand.vmem [shape: f32[8,128], index: 7, kind: output, shape index: {}]  }
   0x1   :  { %13 = vsyncpa [#allocation5], 0  ;;  %s35_s26 = sshll.u32 %s359_s3, 4  ;;  %s287_s27 = smov [#allocation4]   ;;  %s36_s26 = int_to_ptr.hbm [resolvable:$true] %s35_s26 }
   0x2   :  { %s37_s28 = sshll.u32 %s287_s27, 4  ;;  %s20_s8 = sshll.u32 %s357_s1, 4  ;;  %s38_s28 = int_to_ptr.vmem [resolvable:$true] %s37_s28  ;;  %s21_s8 = int_to_ptr.hbm [resolvable:$true] %s20_s8 }
   0x3   :  { %s288_s9 = smov 128   ;;  %s289_s10 = smov 8  }
   0x4   :  { %43 = dma.hbm_to_vmem [thread:$0]  %s36_s26, 2048, %s38_s28, [#allocation5], %s288_s9, %s288_s9, %s289_s10  }
   0x5   :  { %s290_s11 = smov [#allocation2]   ;;  %s50_s15 = sshll.u32 %s361_s5, 4  ;;  %s51_s15 = int_to_ptr.hbm [resolvable:$true] %s50_s15 }
   0x6   :  { %s22_s12 = sshll.u32 %s290_s11, 4  ;;  %s291_s3 = smov [#allocation6]   ;;  %s23_s12 = int_to_ptr.vmem [resolvable:$true] %s22_s12 }
   0x7   :  { %28 = dma.hbm_to_vmem [thread:$0]  %s21_s8, 2048, %s23_s12, [#allocation3], %s288_s9, %s288_s9, %s289_s10  }
   0x8   :  { %s52_s16 = sshll.u32 %s291_s3, 4  ;;  %s53_s16 = int_to_ptr.vmem [resolvable:$true] %s52_s16 }
   0x9   :  { %58 = dma.hbm_to_vmem [thread:$0]  %s51_s15, 2048, %s53_s16, [#allocation5], %s288_s9, %s288_s9, %s289_s10  }
   0xa   :  { %283 = dma.done.wait [#allocation3], 2048  }
   0xb   :  { %284 = vsyncadd [#allocation3], 4294965248 }
   0xc   :  { %285 = dma.done.wait [#allocation5], 4096  }
   0xd   :  { %286 = vsyncadd [#allocation5], 4294963200  ;;  %v89_v0 = vld [vmem:[#allocation2 + $0x78] sm:$0xff]  ;;  %v88_v1 = vld [vmem:[#allocation2 + $0x70] sm:$0xff] }
   0xe   :  { %94 = vmatpush.msra.mxu0 %v89_v0  ;;  %v87_v2 = vld [vmem:[#allocation2 + $0x68] sm:$0xff]  ;;  %v86_v3 = vld [vmem:[#allocation2 + $0x60] sm:$0xff]  ;;  %v130_v4 = vld [vmem:[#allocation4 + $0x78] sm:$0xff] }
   0xf   :  { %v85_v5 = vld [vmem:[#allocation2 + $0x58] sm:$0xff]  ;;  %135 = vmatpush.msra.mxu1 %v130_v4  ;;  %v129_v6 = vld [vmem:[#allocation4 + $0x70] sm:$0xff]  ;;  %v128_v7 = vld [vmem:[#allocation4 + $0x68] sm:$0xff] }
  0x10   :  { %95 = vmatpush.msra.mxu0 %v88_v1  ;;  %v84_v8 = vld [vmem:[#allocation2 + $0x50] sm:$0xff]  ;;  %v127_v9 = vld [vmem:[#allocation4 + $0x60] sm:$0xff]  ;;  %v83_v10 = vld [vmem:[#allocation2 + $0x48] sm:$0xff] }
  0x11   :  { %136 = vmatpush.msra.mxu1 %v129_v6  ;;  %v126_v11 = vld [vmem:[#allocation4 + $0x58] sm:$0xff]  ;;  %v82_v12 = vld [vmem:[#allocation2 + $0x40] sm:$0xff]  ;;  %v125_v13 = vld [vmem:[#allocation4 + $0x50] sm:$0xff] }
  0x12   :  { %96 = vmatpush.msra.mxu0 %v87_v2  ;;  %v81_v14 = vld [vmem:[#allocation2 + $0x38] sm:$0xff]  ;;  %v124_v15 = vld [vmem:[#allocation4 + $0x48] sm:$0xff]  ;;  %v80_v16 = vld [vmem:[#allocation2 + $0x30] sm:$0xff] }
  0x13   :  { %137 = vmatpush.msra.mxu1 %v128_v7  ;;  %v123_v17 = vld [vmem:[#allocation4 + $0x40] sm:$0xff]  ;;  %v79_v18 = vld [vmem:[#allocation2 + $0x28] sm:$0xff]  ;;  %v122_v19 = vld [vmem:[#allocation4 + $0x38] sm:$0xff] }
  0x14   :  { %97 = vmatpush.msra.mxu0 %v86_v3  ;;  %v78_v20 = vld [vmem:[#allocation2 + $0x20] sm:$0xff]  ;;  %v121_v21 = vld [vmem:[#allocation4 + $0x30] sm:$0xff]  ;;  %v77_v22 = vld [vmem:[#allocation2 + $0x18] sm:$0xff] }
  0x15   :  { %138 = vmatpush.msra.mxu1 %v127_v9  ;;  %v120_v23 = vld [vmem:[#allocation4 + $0x28] sm:$0xff]  ;;  %v76_v24 = vld [vmem:[#allocation2 + $0x10] sm:$0xff]  ;;  %v119_v25 = vld [vmem:[#allocation4 + $0x20] sm:$0xff] }
  0x16   :  { %98 = vmatpush.msra.mxu0 %v85_v5  ;;  %v75_v26 = vld [vmem:[#allocation2 + $0x8] sm:$0xff]  ;;  %v118_v27 = vld [vmem:[#allocation4 + $0x18] sm:$0xff]  ;;  %v74_v28 = vld [vmem:[#allocation2] sm:$0xff] }
  0x17   :  { %139 = vmatpush.msra.mxu1 %v126_v11  ;;  %v73_v29 = vld [vmem:[%s356_s0] sm:$0xff]  ;;  %v117_v30 = vld [vmem:[#allocation4 + $0x10] sm:$0xff]  ;;  %v116_v31 = vld [vmem:[#allocation4 + $0x8] sm:$0xff] }
  0x18   :  { %99 = vmatpush.msra.mxu0 %v84_v8  ;;  %v115_v32 = vld [vmem:[#allocation4] sm:$0xff]  ;;  %v171_v33 = vld [vmem:[#allocation6 + $0x78] sm:$0xff]  ;;  %v170_v34 = vld [vmem:[#allocation6 + $0x70] sm:$0xff] }
  0x19   :  { %140 = vmatpush.msra.mxu1 %v125_v13  ;;  %176 = vmatpush.msra.mxu2 %v171_v33  ;;  %v169_v35 = vld [vmem:[#allocation6 + $0x68] sm:$0xff]  ;;  %v168_v36 = vld [vmem:[#allocation6 + $0x60] sm:$0xff]  ;;  %v167_v37 = vld [vmem:[#allocation6 + $0x58] sm:$0xff] }
  0x1a   :  { %100 = vmatpush.msra.mxu0 %v83_v10  ;;  %v166_v38 = vld [vmem:[#allocation6 + $0x50] sm:$0xff]  ;;  %v165_v39 = vld [vmem:[#allocation6 + $0x48] sm:$0xff]  ;;  %v164_v40 = vld [vmem:[#allocation6 + $0x40] sm:$0xff] }
  0x1b   :  { %141 = vmatpush.msra.mxu1 %v124_v15  ;;  %177 = vmatpush.msra.mxu2 %v170_v34  ;;  %v163_v41 = vld [vmem:[#allocation6 + $0x38] sm:$0xff]  ;;  %v162_v42 = vld [vmem:[#allocation6 + $0x30] sm:$0xff]  ;;  %v161_v43 = vld [vmem:[#allocation6 + $0x28] sm:$0xff] }
  0x1c   :  { %101 = vmatpush.msra.mxu0 %v82_v12  ;;  %v160_v44 = vld [vmem:[#allocation6 + $0x20] sm:$0xff]  ;;  %v159_v45 = vld [vmem:[#allocation6 + $0x18] sm:$0xff]  ;;  %v158_v50 = vld [vmem:[#allocation6 + $0x10] sm:$0xff] }
  0x1d   :  { %142 = vmatpush.msra.mxu1 %v123_v17  ;;  %178 = vmatpush.msra.mxu2 %v169_v35  ;;  %v208_v46 = vld [vmem:[%s358_s2] ss:$0 sm:$0xff]  ;;  %v157_v51 = vld [vmem:[#allocation6 + $0x8] sm:$0xff] }
  0x1e   :  { %102 = vmatpush.msra.mxu0 %v81_v14  ;;  %v156_v52 = vld [vmem:[#allocation6] sm:$0xff] }
  0x1f   :  { %143 = vmatpush.msra.mxu1 %v122_v19  ;;  %179 = vmatpush.msra.mxu2 %v168_v36  ;;  %v209_v53 = vld [vmem:[%s360_s4] ss:$0 sm:$0xff] }
  0x20   :  { %103 = vmatpush.msra.mxu0 %v80_v16  ;;  %v210_v57 = vld [vmem:[%s362_s6] ss:$0 sm:$0xff] }
  0x21   :  { %144 = vmatpush.msra.mxu1 %v121_v21  ;;  %180 = vmatpush.msra.mxu2 %v167_v37 }
  0x22   :  { %104 = vmatpush.msra.mxu0 %v79_v18 }
  0x23   :  { %145 = vmatpush.msra.mxu1 %v120_v23  ;;  %181 = vmatpush.msra.mxu2 %v166_v38 }
  0x24   :  { %105 = vmatpush.msra.mxu0 %v78_v20 }
  0x25   :  { %146 = vmatpush.msra.mxu1 %v119_v25  ;;  %182 = vmatpush.msra.mxu2 %v165_v39 }
  0x26   :  { %106 = vmatpush.msra.mxu0 %v77_v22 }
  0x27   :  { %147 = vmatpush.msra.mxu1 %v118_v27  ;;  %183 = vmatpush.msra.mxu2 %v164_v40 }
  0x28   :  { %107 = vmatpush.msra.mxu0 %v76_v24 }
  0x29   :  { %148 = vmatpush.msra.mxu1 %v117_v30  ;;  %184 = vmatpush.msra.mxu2 %v163_v41 }
  0x2a   :  { %108 = vmatpush.msra.mxu0 %v75_v26 }
  0x2b   :  { %149 = vmatpush.msra.mxu1 %v116_v31  ;;  %185 = vmatpush.msra.mxu2 %v162_v42 }
  0x2c   :  { %109 = vmatpush.msra.mxu0 %v74_v28 }
  0x2d   :  { %110 = vmatmul.f32.vlgmr.msra.gmra.mxu0 %v73_v29  ;;  %150 = vmatpush.msra.mxu1 %v115_v32 }
  0x2e   :  { %186 = vmatpush.msra.mxu2 %v161_v43 }
  0x30   :  { %187 = vmatpush.msra.mxu2 %v160_v44 }
  0x32   :  { %188 = vmatpush.msra.mxu2 %v159_v45 }
  0x34   :  { %189 = vmatpush.msra.mxu2 %v158_v50 }
  0x36   :  { %190 = vmatpush.msra.mxu2 %v157_v51 }
  0x38   :  { %191 = vmatpush.msra.mxu2 %v156_v52 }
  0xaa   :  { %v111_v47 = vpop.f32.mrf.mxu0 }
  0xab   :  { %v112_v48 = vadd.f32 %v208_v46, %v111_v47 }
  0xad   :  { %v114_v49 = vmax.f32 %v112_v48, 0.0 }
  0xaf   :  { %151 = vmatmul.f32.vlgmr.msra.gmra.mxu1 %v114_v49 }
 0x12c   :  { %v152_v54 = vpop.f32.mrf.mxu1 }
 0x12d   :  { %v153_v55 = vadd.f32 %v209_v53, %v152_v54 }
 0x12f   :  { %v155_v56 = vmax.f32 %v153_v55, 0.0 }
 0x131   :  { %192 = vmatmul.f32.vlgmr.msra.gmra.mxu2 %v155_v56 }
 0x1b4   :  { %v193_v58 = vpop.f32.mrf.mxu2 }
 0x1b5   :  { %v194_v59 = vadd.f32 %v210_v57, %v193_v58 }
 0x1b7   :  { %196 = vst [vmem:[%s363_s7] sm:$0xff] %v194_v59 }
 0x1b8   :  { %201 = vsyncpa [#allocation3], 1 }
 0x1b9   :  { %202 = vsyncpa [#allocation5], 1 }

</bundles_post_ra>
